<compile_context>
chip_gen: v7x
topology: tpu7x:2x2x1
jax: 0.10.0
libtpu: 0.0.40
codegen_flags: <defaults>
</compile_context>

<pallas_src>
import jax
import jax.numpy as jnp
from jax.experimental import pallas as pl
from jax.experimental.pallas import tpu as pltpu


# ----------------------------- Pallas kernel --------------------------------


def bgaff_kernel(x_ref, y_ref, ah_ref, aw_ref, xg_ref,
                 wl1_ref, bl1_ref, wl2_ref, bl2_ref, eh_ref, o_ref):
    """One (batch-block, H-tile) step.

    x_ref, y_ref, o_ref : (Nb, Ht, W*C)   bf16 in HBM, lane-dense blocks
    ah_ref              : (Nb, Ht, oup)   precomputed coordinate-attention rows
    aw_ref, xg_ref      : (Nb, 1,  W*oup) precomputed, already lane-interleaved
    wl1/bl1/wl2/bl2     : block-diagonally packed local-attention 1x1 convs
    eh_ref              : (oup, W*oup)    0/1 expander: a_h -> lane-interleaved layout
    """
    nb, ht, wc = x_ref.shape
    rows = nb * ht
    wo = aw_ref.shape[-1]

    x = x_ref[...].astype(jnp.float32)            # (nb, ht, W*C), lane-dense
    y = y_ref[...].astype(jnp.float32)

    # ---- local attention: conv1x1 -> BN -> ReLU -> conv1x1 -> BN (BN folded) ----
    # Block-diagonal weight packing keeps the operands in the lane-dense layout, so the
    # reshape below only merges leading (sublane-aligned) dims: no lane relayout.
    z = (x + y).reshape(rows, wc)
    h1 = jnp.maximum(
        jnp.dot(z, wl1_ref[...], preferred_element_type=jnp.float32) + bl1_ref[...],
        0.0)                                                       # (rows, W*mip)
    xl = jnp.dot(h1, wl2_ref[...], preferred_element_type=jnp.float32) + bl2_ref[...]  # (rows, W*oup)

    # ---- wei = sigmoid(local + global); xg is per-batch and pre-interleaved ----
    wei = jax.nn.sigmoid(xl.reshape(nb, ht, wo) + xg_ref[...])     # (nb, ht, W*oup)

    # ---- coordinate attention: expand a_h to the interleaved layout via a tiny
    #      0/1 matmul (MXU slot) instead of a cross-lane relayout (XLU) ----
    ah = ah_ref[...].reshape(rows, ah_ref.shape[-1])               # (rows, oup)
    ahf = jnp.dot(ah, eh_ref[...], preferred_element_type=jnp.float32).reshape(nb, ht, wo)

    atten = ahf * aw_ref[...] + wei                                # a_w * a_h + wei
    out = x * atten + y * (1.0 - atten)       # requires oup == inp (asserted in wrapper)
    o_ref[...] = out.astype(o_ref.dtype)


def _choose_tiles(n, h, wc, budget_bytes=12 << 20):
    """Pick (batch-block, H-tile) so the per-step working set stays well under the VMEM
    limit (re-derived for v7x's 64 MiB) while keeping enough rows per step to amortize
    grid overhead / MXU fill.  Tiny images pack several batch elements per step."""
    # Rough per-spatial-row footprint: x/y/out bf16 double-buffered + ~8 f32 temporaries.
    row_bytes = wc * (3 * 2 * 2 + 8 * 4)
    max_rows = max(8, budget_bytes // row_bytes)

    if h <= max_rows:
        ht = h
    else:
        ht = 8
        d = 8
        while d <= max_rows:
            if h % d == 0:
                ht = d
            d += 8
        assert h % ht == 0, "H must be divisible by a multiple-of-8 tile when tiling"

    nb = 1
    if ht == h:                                   # tiny image: batch-block per step
        nb = min(n, max(1, max_rows // h))
        while nb > 1 and n % nb != 0:
            nb -= 1
    return nb, ht


def _bgaff_pallas(x2, y2, a_h, aw_flat, xg_flat, wl1p, bl1p, wl2p, bl2p, ehp):
    """x2, y2: (N, H, W*C) bf16.  Returns (N, H, W*C) bf16."""
    n, h, wc = x2.shape
    oup = a_h.shape[-1]
    wo = aw_flat.shape[-1]
    nb, ht = _choose_tiles(n, h, wc)
    grid = (n // nb, h // ht)

    img_spec = pl.BlockSpec((nb, ht, wc), lambda b, i: (b, i, 0))
    ah_spec = pl.BlockSpec((nb, ht, oup), lambda b, i: (b, i, 0))
    row_spec = pl.BlockSpec((nb, 1, wo), lambda b, i: (b, 0, 0))

    def full_spec(a):
        return pl.BlockSpec(a.shape, lambda b, i: (0, 0))

    weights = (wl1p, bl1p, wl2p, bl2p, ehp)

    return pl.pallas_call(
        bgaff_kernel,
        out_shape=jax.ShapeDtypeStruct((n, h, wc), x2.dtype),
        grid_spec=pltpu.PrefetchScalarGridSpec(
            num_scalar_prefetch=0,
            grid=grid,
            in_specs=[img_spec, img_spec, ah_spec, row_spec, row_spec]
                     + [full_spec(w) for w in weights],
            out_specs=img_spec,
        ),
        compiler_params=pltpu.CompilerParams(
            dimension_semantics=("parallel", "parallel"),
            vmem_limit_bytes=48 * 1024 * 1024),
    )(x2, y2, a_h, aw_flat, xg_flat, *weights)


# ------------------------------ forward pass --------------------------------


def bgaff_forward(x, y, params):
    """NHWC in / NHWC out — no layout transposes anywhere.

    x, y: (N, H, W, C) float.  Returns (N, H, W, C) bfloat16.
    """
    (wl1, bl1, wl2, bl2, wg1, bg1, wg2, bg2, w1, b1, wh, bh, ww, bw) = params
    n, h, w, c = x.shape
    oup = wl2.shape[1]
    assert oup == c, "final fusion x*atten + y*(1-atten) requires oup == inp"

    # bf16 images in HBM (halves DMA bytes on every generation); compute stays f32.
    x_lo = x.astype(jnp.bfloat16)
    y_lo = y.astype(jnp.bfloat16)

    # ---- tiny pooled branches, precomputed in plain JAX (O(H+W+1) rows of work) ----
    xf = x_lo.astype(jnp.float32)
    yf = y_lo.astype(jnp.float32)
    z = xf + yf
    z_h = z.mean(axis=2)                          # (N, H, C)  pool over W
    z_w = z.mean(axis=1)                          # (N, W, C)  pool over H
    zg = z_h.mean(axis=1, keepdims=True)          # (N, 1, C)  global pool

    def hswish(t):
        return t * jnp.clip(t + 3.0, 0.0, 6.0) * (1.0 / 6.0)

    xg = jnp.maximum(zg @ wg1 + bg1, 0.0) @ wg2 + bg2          # (N, 1, oup)
    a_h = jax.nn.sigmoid(hswish(z_h @ w1 + b1) @ wh + bh)       # (N, H, oup)
    a_w = jax.nn.sigmoid(hswish(z_w @ w1 + b1) @ ww + bw)       # (N, W, oup)

    # Lane-interleaved (w-major, channel-minor) flattenings for the kernel.
    aw_flat = a_w.reshape(n, 1, w * oup)
    xg_flat = jnp.tile(xg, (1, 1, w))                           # (N, 1, W*oup)

    # ---- block-diagonal packing of the local-attention 1x1 convs so the hot kernel
    #      stays in the lane-dense (rows, W*C) layout with zero in-kernel relayouts ----
    eye_w = jnp.eye(w, dtype=jnp.float32)
    wl1p = jnp.kron(eye_w, wl1)                                 # (W*C,  W*mip)
    bl1p = jnp.tile(bl1, (1, w))                                # (1, W*mip)
    wl2p = jnp.kron(eye_w, wl2)                                 # (W*mip, W*oup)
    bl2p = jnp.tile(bl2, (1, w))                                # (1, W*oup)
    ehp = jnp.kron(jnp.ones((1, w), jnp.float32),
                   jnp.eye(oup, dtype=jnp.float32))             # (oup, W*oup)

    # ---- lane-dense main kernel (free reshapes: NHWC is contiguous) ----
    x2 = x_lo.reshape(n, h, w * c)
    y2 = y_lo.reshape(n, h, w * c)
    out2 = _bgaff_pallas(x2, y2, a_h, aw_flat, xg_flat, wl1p, bl1p, wl2p, bl2p, ehp)
    return out2.reshape(n, h, w, c)


# --------------------------- parameter construction -------------------------


def fold_conv_bn(w, b, gamma, beta, mean, var, eps=1e-5):
    """Fold eval-mode BatchNorm into a 1x1 conv expressed as (in, out) matrix + bias."""
    scale = gamma / jnp.sqrt(var + eps)
    w_eff = w * scale[None, :]
    b_eff = (b - mean) * scale + beta
    return w_eff, b_eff


def make_params(key, inp, oup, reduction=32):
    mip = max(8, inp // reduction)
    ks = iter(jax.random.split(key, 64))

    def conv(cin, cout):
        w = 0.2 * jax.random.normal(next(ks), (cin, cout), jnp.float32)
        b = 0.1 * jax.random.normal(next(ks), (cout,), jnp.float32)
        return w, b

    def bn(c):
        gamma = 1.0 + 0.1 * jax.random.normal(next(ks), (c,), jnp.float32)
        beta = 0.1 * jax.random.normal(next(ks), (c,), jnp.float32)
        mean = 0.1 * jax.random.normal(next(ks), (c,), jnp.float32)
        var = 1.0 + 0.1 * jnp.abs(jax.random.normal(next(ks), (c,), jnp.float32))
        return gamma, beta, mean, var

    # local_att: conv(inp->mip)+BN+ReLU+conv(mip->oup)+BN
    wl1, bl1 = fold_conv_bn(*conv(inp, mip), *bn(mip))
    wl2, bl2 = fold_conv_bn(*conv(mip, oup), *bn(oup))
    # global_att: pool + conv(inp->mip)+BN+ReLU+conv(mip->oup)+BN
    wg1, bg1 = fold_conv_bn(*conv(inp, mip), *bn(mip))
    wg2, bg2 = fold_conv_bn(*conv(mip, oup), *bn(oup))
    # coordinate attention: conv1(inp->mip)+bn1, conv_h(mip->oup), conv_w(mip->oup)
    w1, b1 = fold_conv_bn(*conv(inp, mip), *bn(mip))
    wh, bh = conv(mip, oup)
    ww, bw = conv(mip, oup)

    def as2d(b):  # biases as (1, C) rows
        return b.reshape(1, -1)

    return (wl1, as2d(bl1), wl2, as2d(bl2),
            wg1, as2d(bg1), wg2, as2d(bg2),
            w1, as2d(b1), wh, as2d(bh), ww, as2d(bw))


# ------------------------------- reference ----------------------------------


def bgaff_ref_nhwc(x, y, params):
    (wl1, bl1, wl2, bl2, wg1, bg1, wg2, bg2, w1, b1, wh, bh, ww, bw) = params
    z = x + y
    n, h, w, c = z.shape
    z2 = z.reshape(n, h * w, c)
    h1 = jnp.maximum(z2 @ wl1 + bl1, 0.0)
    xl = h1 @ wl2 + bl2
    zg = z2.mean(axis=1, keepdims=True)
    g1 = jnp.maximum(zg @ wg1 + bg1, 0.0)
    xg = g1 @ wg2 + bg2
    wei = jax.nn.sigmoid(xl + xg).reshape(n, h, w, -1)
    z_h = z.mean(axis=2)                       # (N, H, C)
    z_w = z.mean(axis=1)                       # (N, W, C)
    zc = jnp.concatenate([z_h, z_w], axis=1)   # (N, H+W, C)
    t = zc @ w1 + b1
    t = t * jnp.clip(t + 3.0, 0.0, 6.0) / 6.0
    t_h, t_w = t[:, :h], t[:, h:]
    a_h = jax.nn.sigmoid(t_h @ wh + bh)        # (N, H, oup)
    a_w = jax.nn.sigmoid(t_w @ ww + bw)        # (N, W, oup)
    atten = a_h[:, :, None, :] * a_w[:, None, :, :] + wei
    return x * atten + y * (1.0 - atten)


# --------------------------------- main --------------------------------------


if __name__ == "__main__":
    N, H, W, C = 2, 16, 16, 16          # inp = oup = 16, mip = max(8, 16//32) = 8
    key = jax.random.PRNGKey(0)
    kx, ky, kp = jax.random.split(key, 3)

    x = jax.random.normal(kx, (N, H, W, C), jnp.float32)
    y = jax.random.normal(ky, (N, H, W, C), jnp.float32)
    params = make_params(kp, inp=C, oup=C, reduction=32)

    fwd = jax.jit(bgaff_forward)
    out = jax.block_until_ready(fwd(x, y, params))

    # Reference on the same bf16-quantized inputs the kernel reads from HBM.
    xq = x.astype(jnp.bfloat16).astype(jnp.float32)
    yq = y.astype(jnp.bfloat16).astype(jnp.float32)
    ref = bgaff_ref_nhwc(xq, yq, params)

    assert out.shape == (N, H, W, C)
    assert out.dtype == jnp.bfloat16
    assert jnp.allclose(out.astype(jnp.float32), ref, atol=2e-2, rtol=2e-2)

    print("KERNEL_OK")
</pallas_src>

<mosaic_0001>
module attributes {stable_mosaic.version = 11 : i64} {
  func.func @bgaff_kernel(%arg0: i32, %arg1: i32, %arg2: memref<2x16x256xbf16, #tpu.memory_space<vmem>>, %arg3: memref<2x16x256xbf16, #tpu.memory_space<vmem>>, %arg4: memref<2x16x16xf32, #tpu.memory_space<vmem>>, %arg5: memref<2x1x256xf32, #tpu.memory_space<vmem>>, %arg6: memref<2x1x256xf32, #tpu.memory_space<vmem>>, %arg7: memref<256x128xf32, #tpu.memory_space<vmem>>, %arg8: memref<1x128xf32, #tpu.memory_space<vmem>>, %arg9: memref<128x256xf32, #tpu.memory_space<vmem>>, %arg10: memref<1x256xf32, #tpu.memory_space<vmem>>, %arg11: memref<16x256xf32, #tpu.memory_space<vmem>>, %arg12: memref<2x16x256xbf16, #tpu.memory_space<vmem>>) attributes {dimension_semantics = [#tpu.dimension_semantics<parallel>, #tpu.dimension_semantics<parallel>], iteration_bounds = array<i64: 1, 1>, scalar_prefetch = 0 : i64, scratch_operands = 0 : i64, tpu.core_type = #tpu.core_type<tc>, window_params = [{transform_indices = @transform_0, window_bounds = array<i64: 2, 16, 256>}, {transform_indices = @transform_1, window_bounds = array<i64: 2, 16, 256>}, {transform_indices = @transform_2, window_bounds = array<i64: 2, 16, 16>}, {transform_indices = @transform_3, window_bounds = array<i64: 2, 1, 256>}, {transform_indices = @transform_4, window_bounds = array<i64: 2, 1, 256>}, {pipeline_mode = #tpu.pipeline_mode<synchronous>, transform_indices = @transform_5, window_bounds = array<i64: 256, 128>}, {pipeline_mode = #tpu.pipeline_mode<synchronous>, transform_indices = @transform_6, window_bounds = array<i64: 1, 128>}, {pipeline_mode = #tpu.pipeline_mode<synchronous>, transform_indices = @transform_7, window_bounds = array<i64: 128, 256>}, {pipeline_mode = #tpu.pipeline_mode<synchronous>, transform_indices = @transform_8, window_bounds = array<i64: 1, 256>}, {pipeline_mode = #tpu.pipeline_mode<synchronous>, transform_indices = @transform_9, window_bounds = array<i64: 16, 256>}, {transform_indices = @transform_10, window_bounds = array<i64: 2, 16, 256>}]} {
    %c0 = arith.constant 0 : index
    %c0_0 = arith.constant 0 : index
    %c0_1 = arith.constant 0 : index
    %0 = vector.load %arg2[%c0, %c0_0, %c0_1] : memref<2x16x256xbf16, #tpu.memory_space<vmem>>, vector<2x16x256xbf16>
    %1 = arith.extf %0 : vector<2x16x256xbf16> to vector<2x16x256xf32>
    %c0_2 = arith.constant 0 : index
    %c0_3 = arith.constant 0 : index
    %c0_4 = arith.constant 0 : index
    %2 = vector.load %arg3[%c0_2, %c0_3, %c0_4] : memref<2x16x256xbf16, #tpu.memory_space<vmem>>, vector<2x16x256xbf16>
    %3 = arith.extf %2 : vector<2x16x256xbf16> to vector<2x16x256xf32>
    %4 = arith.addf %1, %3 : vector<2x16x256xf32>
    %5 = vector.shape_cast %4 : vector<2x16x256xf32> to vector<32x256xf32>
    %c0_5 = arith.constant 0 : index
    %c0_6 = arith.constant 0 : index
    %6 = vector.load %arg7[%c0_5, %c0_6] : memref<256x128xf32, #tpu.memory_space<vmem>>, vector<256x128xf32>
    %cst = arith.constant dense<0.000000e+00> : vector<32x128xf32>
    %7 = tpu.matmul %5, %6, %cst {dimension_numbers = #tpu.dot_dimension_numbers<[1], [0], [0], [1], [0, 0, 1, 1], [], []>} : vector<32x256xf32>, vector<256x128xf32>, vector<32x128xf32> -> vector<32x128xf32>
    %c0_7 = arith.constant 0 : index
    %c0_8 = arith.constant 0 : index
    %8 = vector.load %arg8[%c0_7, %c0_8] : memref<1x128xf32, #tpu.memory_space<vmem>>, vector<1x128xf32>
    %9 = vector.broadcast %8 : vector<1x128xf32> to vector<32x128xf32>
    %10 = arith.addf %7, %9 : vector<32x128xf32>
    %cst_9 = arith.constant 0.000000e+00 : f32
    %11 = vector.broadcast %cst_9 : f32 to vector<32x128xf32>
    %12 = arith.maximumf %10, %11 : vector<32x128xf32>
    %c0_10 = arith.constant 0 : index
    %c0_11 = arith.constant 0 : index
    %13 = vector.load %arg9[%c0_10, %c0_11] : memref<128x256xf32, #tpu.memory_space<vmem>>, vector<128x256xf32>
    %cst_12 = arith.constant dense<0.000000e+00> : vector<32x256xf32>
    %14 = tpu.matmul %12, %13, %cst_12 {dimension_numbers = #tpu.dot_dimension_numbers<[1], [0], [0], [1], [0, 0, 1, 1], [], []>} : vector<32x128xf32>, vector<128x256xf32>, vector<32x256xf32> -> vector<32x256xf32>
    %c0_13 = arith.constant 0 : index
    %c0_14 = arith.constant 0 : index
    %15 = vector.load %arg10[%c0_13, %c0_14] : memref<1x256xf32, #tpu.memory_space<vmem>>, vector<1x256xf32>
    %16 = vector.broadcast %15 : vector<1x256xf32> to vector<32x256xf32>
    %17 = arith.addf %14, %16 : vector<32x256xf32>
    %18 = vector.shape_cast %17 : vector<32x256xf32> to vector<2x16x256xf32>
    %c0_15 = arith.constant 0 : index
    %c0_16 = arith.constant 0 : index
    %c0_17 = arith.constant 0 : index
    %19 = vector.load %arg6[%c0_15, %c0_16, %c0_17] : memref<2x1x256xf32, #tpu.memory_space<vmem>>, vector<2x1x256xf32>
    %20 = vector.broadcast %19 : vector<2x1x256xf32> to vector<2x16x256xf32>
    %21 = arith.addf %18, %20 : vector<2x16x256xf32>
    %22 = arith.negf %21 : vector<2x16x256xf32>
    %23 = math.exp %22 : vector<2x16x256xf32>
    %cst_18 = arith.constant 1.000000e+00 : f32
    %24 = vector.broadcast %cst_18 : f32 to vector<2x16x256xf32>
    %25 = arith.addf %24, %23 : vector<2x16x256xf32>
    %26 = arith.divf %24, %25 : vector<2x16x256xf32>
    %c0_19 = arith.constant 0 : index
    %c0_20 = arith.constant 0 : index
    %c0_21 = arith.constant 0 : index
    %27 = vector.load %arg4[%c0_19, %c0_20, %c0_21] : memref<2x16x16xf32, #tpu.memory_space<vmem>>, vector<2x16x16xf32>
    %28 = vector.shape_cast %27 : vector<2x16x16xf32> to vector<32x16xf32>
    %c0_22 = arith.constant 0 : index
    %c0_23 = arith.constant 0 : index
    %29 = vector.load %arg11[%c0_22, %c0_23] : memref<16x256xf32, #tpu.memory_space<vmem>>, vector<16x256xf32>
    %cst_24 = arith.constant dense<0.000000e+00> : vector<32x256xf32>
    %30 = tpu.matmul %28, %29, %cst_24 {dimension_numbers = #tpu.dot_dimension_numbers<[1], [0], [0], [1], [0, 0, 1, 1], [], []>} : vector<32x16xf32>, vector<16x256xf32>, vector<32x256xf32> -> vector<32x256xf32>
    %31 = vector.shape_cast %30 : vector<32x256xf32> to vector<2x16x256xf32>
    %c0_25 = arith.constant 0 : index
    %c0_26 = arith.constant 0 : index
    %c0_27 = arith.constant 0 : index
    %32 = vector.load %arg5[%c0_25, %c0_26, %c0_27] : memref<2x1x256xf32, #tpu.memory_space<vmem>>, vector<2x1x256xf32>
    %33 = vector.broadcast %32 : vector<2x1x256xf32> to vector<2x16x256xf32>
    %34 = arith.mulf %31, %33 : vector<2x16x256xf32>
    %35 = arith.addf %34, %26 : vector<2x16x256xf32>
    %36 = arith.mulf %1, %35 : vector<2x16x256xf32>
    %cst_28 = arith.constant 1.000000e+00 : f32
    %37 = vector.broadcast %cst_28 : f32 to vector<2x16x256xf32>
    %38 = arith.subf %37, %35 : vector<2x16x256xf32>
    %39 = arith.mulf %3, %38 : vector<2x16x256xf32>
    %40 = arith.addf %36, %39 : vector<2x16x256xf32>
    %41 = arith.truncf %40 : vector<2x16x256xf32> to vector<2x16x256xbf16>
    %c0_29 = arith.constant 0 : index
    %c0_30 = arith.constant 0 : index
    %c0_31 = arith.constant 0 : index
    %42 = vector.load %arg12[%c0_29, %c0_30, %c0_31] : memref<2x16x256xbf16, #tpu.memory_space<vmem>>, vector<2x16x256xbf16>
    tpu.vector_store %arg12[%c0_29, %c0_30, %c0_31], %41 {strides = array<i32>} : memref<2x16x256xbf16, #tpu.memory_space<vmem>>, vector<2x16x256xbf16>,
    return
  }
  func.func @transform_0(%arg0: i32, %arg1: i32) -> (i32, i32, i32) {
    %c0_i32 = arith.constant 0 : i32
    %c0_i32_0 = arith.constant 0 : i32
    return %arg0, %arg1, %c0_i32 : i32, i32, i32
  }
  func.func @transform_1(%arg0: i32, %arg1: i32) -> (i32, i32, i32) {
    %c0_i32 = arith.constant 0 : i32
    %c0_i32_0 = arith.constant 0 : i32
    return %arg0, %arg1, %c0_i32 : i32, i32, i32
  }
  func.func @transform_2(%arg0: i32, %arg1: i32) -> (i32, i32, i32) {
    %c0_i32 = arith.constant 0 : i32
    %c0_i32_0 = arith.constant 0 : i32
    return %arg0, %arg1, %c0_i32 : i32, i32, i32
  }
  func.func @transform_3(%arg0: i32, %arg1: i32) -> (i32, i32, i32) {
    %c0_i32 = arith.constant 0 : i32
    %c0_i32_0 = arith.constant 0 : i32
    %c0_i32_1 = arith.constant 0 : i32
    return %arg0, %c0_i32, %c0_i32_0 : i32, i32, i32
  }
  func.func @transform_4(%arg0: i32, %arg1: i32) -> (i32, i32, i32) {
    %c0_i32 = arith.constant 0 : i32
    %c0_i32_0 = arith.constant 0 : i32
    %c0_i32_1 = arith.constant 0 : i32
    return %arg0, %c0_i32, %c0_i32_0 : i32, i32, i32
  }
  func.func @transform_5(%arg0: i32, %arg1: i32) -> (i32, i32) {
    %c0_i32 = arith.constant 0 : i32
    %c0_i32_0 = arith.constant 0 : i32
    %c0_i32_1 = arith.constant 0 : i32
    return %c0_i32, %c0_i32_0 : i32, i32
  }
  func.func @transform_6(%arg0: i32, %arg1: i32) -> (i32, i32) {
    %c0_i32 = arith.constant 0 : i32
    %c0_i32_0 = arith.constant 0 : i32
    %c0_i32_1 = arith.constant 0 : i32
    return %c0_i32, %c0_i32_0 : i32, i32
  }
  func.func @transform_7(%arg0: i32, %arg1: i32) -> (i32, i32) {
    %c0_i32 = arith.constant 0 : i32
    %c0_i32_0 = arith.constant 0 : i32
    %c0_i32_1 = arith.constant 0 : i32
    return %c0_i32, %c0_i32_0 : i32, i32
  }
  func.func @transform_8(%arg0: i32, %arg1: i32) -> (i32, i32) {
    %c0_i32 = arith.constant 0 : i32
    %c0_i32_0 = arith.constant 0 : i32
    %c0_i32_1 = arith.constant 0 : i32
    return %c0_i32, %c0_i32_0 : i32, i32
  }
  func.func @transform_9(%arg0: i32, %arg1: i32) -> (i32, i32) {
    %c0_i32 = arith.constant 0 : i32
    %c0_i32_0 = arith.constant 0 : i32
    %c0_i32_1 = arith.constant 0 : i32
    return %c0_i32, %c0_i32_0 : i32, i32
  }
  func.func @transform_10(%arg0: i32, %arg1: i32) -> (i32, i32, i32) {
    %c0_i32 = arith.constant 0 : i32
    %c0_i32_0 = arith.constant 0 : i32
    return %arg0, %arg1, %c0_i32 : i32, i32, i32
  }
}

</mosaic_0001>

<bundles_post_ra>
// kernel: bgaff_forward.1
= control target key start
LH: loop header
LB: loop body
LE: loop exit
PB: predicated region body
PF: predicated region fallthrough
CT: control target
= control target key end

     0   :  { %vm416_vm0 = vcmask 130048   ;;  %s1245_s5 = inlined_call_operand.vmem [shape: f32[256,128], index: 5, kind: input, shape index: {}]   ;;  %s1246_s0 = inlined_call_operand.vmem [shape: bf16[2,16,256], index: 0, kind: input, shape index: {}]   ;;  %s1247_s1 = inlined_call_operand.vmem [shape: bf16[2,16,256], index: 1, kind: input, shape index: {}]   ;;  %s1248_s7 = inlined_call_operand.vmem [shape: f32[128,256], index: 7, kind: input, shape index: {}]   ;;  %s1249_s9 = inlined_call_operand.vmem [shape: f32[16,256], index: 9, kind: input, shape index: {}]   ;;  %s1250_s2 = inlined_call_operand.vmem [shape: f32[2,16,16], index: 2, kind: input, shape index: {}]   ;;  %s1251_s6 = inlined_call_operand.vmem [shape: f32[1,128], index: 6, kind: input, shape index: {}]   ;;  %s1252_s8 = inlined_call_operand.vmem [shape: f32[1,256], index: 8, kind: input, shape index: {}]   ;;  %s1253_s4 = inlined_call_operand.vmem [shape: f32[2,1,256], index: 4, kind: input, shape index: {}]   ;;  %s1254_s3 = inlined_call_operand.vmem [shape: f32[2,1,256], index: 3, kind: input, shape index: {}]   ;;  %s1255_s10 = inlined_call_operand.vmem [shape: bf16[2,16,256], index: 10, kind: output, shape index: {}]  }
   0x1   :  { %v83_v0 = vld [vmem:[%s1245_s5 + $0x80] sm:$0xff]  ;;  %v84_v1 = vld [vmem:[%s1245_s5 + $0x88] sm:$0xff]  ;;  %v85_v5 = vld [vmem:[%s1245_s5 + $0x90] sm:$0xff] }
   0x2   :  { %v67_v2 = vld [vmem:[%s1245_s5] sm:$0xff]  ;;  %v687_v3 = vpack.c.bf16 %v84_v1, %v83_v0  ;;  %v68_v4 = vld [vmem:[%s1245_s5 + $0x8] sm:$0xff]  ;;  %v86_v6 = vld [vmem:[%s1245_s5 + $0x98] sm:$0xff] }
   0x3   :  { %v689_v7 = vpack.c.bf16 %v68_v4, %v67_v2  ;;  %v691_v8 = vpack.c.bf16 %v86_v6, %v85_v5  ;;  %v69_v9 = vld [vmem:[%s1245_s5 + $0x10] sm:$0xff]  ;;  %v70_v10 = vld [vmem:[%s1245_s5 + $0x18] sm:$0xff]  ;;  %v87_v11 = vld [vmem:[%s1245_s5 + $0xa0] sm:$0xff] }
   0x4   :  { %688 = vmatprep.subr.bf16.mxu0 %v687_v3  ;;  %v88_v12 = vld [vmem:[%s1245_s5 + $0xa8] sm:$0xff]  ;;  %v693_v13 = vpack.c.bf16 %v70_v10, %v69_v9  ;;  %v71_v15 = vld [vmem:[%s1245_s5 + $0x20] sm:$0xff]  ;;  %v89_v17 = vld [vmem:[%s1245_s5 + $0xb0] sm:$0xff] }
   0x5   :  { %690 = vmatpush3.bf16.msra.mxu0 %v689_v7  ;;  %v695_v14 = vpack.c.bf16 %v88_v12, %v87_v11  ;;  %v72_v16 = vld [vmem:[%s1245_s5 + $0x28] sm:$0xff]  ;;  %v90_v18 = vld [vmem:[%s1245_s5 + $0xb8] sm:$0xff]  ;;  %v73_v21 = vld [vmem:[%s1245_s5 + $0x30] sm:$0xff] }
   0x6   :  { %692 = vmatprep.subr.bf16.mxu0 %v691_v8  ;;  %v697_v19 = vpack.c.bf16 %v72_v16, %v71_v15  ;;  %v699_v20 = vpack.c.bf16 %v90_v18, %v89_v17  ;;  %v74_v22 = vld [vmem:[%s1245_s5 + $0x38] sm:$0xff]  ;;  %v91_v23 = vld [vmem:[%s1245_s5 + $0xc0] sm:$0xff]  ;;  %v92_v24 = vld [vmem:[%s1245_s5 + $0xc8] sm:$0xff] }
   0x7   :  { %v903_v25 = vld [vmem:[%s1246_s0] sm:$0xff]  ;;  %v701_v28 = vpack.c.bf16 %v74_v22, %v73_v21  ;;  %v76_v30 = vld [vmem:[%s1245_s5 + $0x48] sm:$0xff]  ;;  %v93_v31 = vld [vmem:[%s1245_s5 + $0xd0] sm:$0xff]  ;;  %v703_v33 = vpack.c.bf16 %v92_v24, %v91_v23 }
   0x8   :  { %v40_v26 = vunpack.c.h.bf16 %v903_v25  ;;  %v909_v27 = vld [vmem:[%s1247_s1] sm:$0xff]  ;;  %v94_v34 = vld [vmem:[%s1245_s5 + $0xd8] sm:$0xff]  ;;  %v196_v35 = vld [vmem:[%s1248_s7 + $0x8] sm:$0xff]  ;;  %v39_v15 = vunpack.c.l.bf16 %v903_v25 }
   0x9   :  { %694 = vmatpush3.bf16.msra.mxu0 %v693_v13  ;;  %v75_v29 = vld [vmem:[%s1245_s5 + $0x40] sm:$0xff]  ;;  %v52_v32 = vunpack.c.h.bf16 %v909_v27  ;;  %v198_v36 = vld [vmem:[%s1248_s7 + $0x18] sm:$0xff]  ;;  %v197_v39 = vld [vmem:[%s1248_s7 + $0x10] sm:$0xff]  ;;  %v707_v47 = vpack.c.bf16 %v94_v34, %v93_v31  ;;  %v51_v16 = vunpack.c.l.bf16 %v909_v27 }
   0xa   :  { %696 = vmatprep.subr.bf16.mxu0 %v695_v14  ;;  %v195_v38 = vld [vmem:[%s1248_s7] sm:$0xff]  ;;  %v200_v40 = vld [vmem:[%s1248_s7 + $0x28] sm:$0xff]  ;;  %v202_v41 = vld [vmem:[%s1248_s7 + $0x38] sm:$0xff]  ;;  %v705_v42 = vpack.c.bf16 %v76_v30, %v75_v29  ;;  %v719_v44 = vpack.c.bf16 %v198_v36, %v196_v35 }
   0xb   :  { %v60_v37 = vadd.f32 %v52_v32, %v40_v26  ;;  %v77_v43 = vld [vmem:[%s1245_s5 + $0x50] sm:$0xff]  ;;  %v199_v45 = vld [vmem:[%s1248_s7 + $0x20] sm:$0xff]  ;;  %v78_v48 = vld [vmem:[%s1245_s5 + $0x58] sm:$0xff]  ;;  %v721_v49 = vpack.c.bf16 %v197_v39, %v195_v38  ;;  %v723_v50 = vpack.c.bf16 %v202_v41, %v200_v40  ;;  %v59_v31 = vadd.f32 %v51_v16, %v39_v15 }
   0xc   :  { %v201_v46 = vld [vmem:[%s1248_s7 + $0x30] sm:$0xff]  ;;  %v204_v51 = vld [vmem:[%s1248_s7 + $0x48] sm:$0xff]  ;;  %v206_v52 = vld [vmem:[%s1248_s7 + $0x58] sm:$0xff]  ;;  %720 = vmatprep.subr.bf16.mxu1 %v719_v44  ;;  %v709_v56 = vpack.c.bf16 %v78_v48, %v77_v43 }
   0xd   :  { %698 = vmatpush3.bf16.msra.mxu0 %v697_v19  ;;  %170 = vmatprep.mubr.f32.mxu0 %v60_v37  ;;  %v95_v53 = vld [vmem:[%s1245_s5 + $0xe0] sm:$0xff]  ;;  %v96_v54 = vld [vmem:[%s1245_s5 + $0xe8] sm:$0xff]  ;;  %v725_v55 = vpack.c.bf16 %v201_v46, %v199_v45  ;;  %v727_v58 = vpack.c.bf16 %v206_v52, %v204_v51  ;;  %v205_v60 = vld [vmem:[%s1248_s7 + $0x50] sm:$0xff] }
   0xe   :  { %700 = vmatprep.subr.bf16.mxu0 %v699_v20  ;;  %722 = vmatpush1.bf16.msra.mxu1 %v721_v49  ;;  %v79_v57 = vld [vmem:[%s1245_s5 + $0x60] sm:$0xff]  ;;  %v711_v61 = vpack.c.bf16 %v96_v54, %v95_v53  ;;  %v80_v62 = vld [vmem:[%s1245_s5 + $0x68] sm:$0xff]  ;;  %v210_v0 = vld [vmem:[%s1248_s7 + $0x78] sm:$0xff] }
   0xf   :  { %724 = vmatprep.subr.bf16.mxu1 %v723_v50  ;;  %v203_v59 = vld [vmem:[%s1248_s7 + $0x40] sm:$0xff]  ;;  %v208_v63 = vld [vmem:[%s1248_s7 + $0x68] sm:$0xff]  ;;  %v97_v1 = vld [vmem:[%s1245_s5 + $0xf0] sm:$0xff]  ;;  %v713_v6 = vpack.c.bf16 %v80_v62, %v79_v57 }
  0x10   :  { %v98_v2 = vld [vmem:[%s1245_s5 + $0xf8] sm:$0xff]  ;;  %v81_v3 = vld [vmem:[%s1245_s5 + $0x70] sm:$0xff]  ;;  %v729_v5 = vpack.c.bf16 %v205_v60, %v203_v59  ;;  %v1003_v7 = vld [vmem:[%s1246_s0 + $0x8] sm:$0xff]  ;;  %v731_v8 = vpack.c.bf16 %v210_v0, %v208_v63 }
  0x11   :  { %702 = vmatpush3.bf16.msra.mxu0 %v701_v28  ;;  %v82_v4 = vld [vmem:[%s1245_s5 + $0x78] sm:$0xff]  ;;  %v207_v9 = vld [vmem:[%s1248_s7 + $0x60] sm:$0xff]  ;;  %v209_v10 = vld [vmem:[%s1248_s7 + $0x70] sm:$0xff]  ;;  %v715_v11 = vpack.c.bf16 %v98_v2, %v97_v1  ;;  %v42_v19 = vunpack.c.h.bf16 %v1003_v7 }
  0x12   :  { %704 = vmatprep.subr.bf16.mxu0 %v703_v33  ;;  %726 = vmatpush1.bf16.msra.mxu1 %v725_v55  ;;  %v1014_v12 = vld [vmem:[%s1247_s1 + $0x8] sm:$0xff]  ;;  %v214_v14 = vld [vmem:[%s1248_s7 + $0x98] sm:$0xff]  ;;  %v733_v17 = vpack.c.bf16 %v209_v10, %v207_v9  ;;  %v717_v18 = vpack.c.bf16 %v82_v4, %v81_v3  ;;  %v1029_v21 = vld [vmem:[%s1246_s0 + $0x10] sm:$0xff]  ;;  %v41_v33 = vunpack.c.l.bf16 %v1003_v7  ;;  %v790_v4 = vmov 0.0  }
  0x13   :  { %728 = vmatprep.subr.bf16.mxu1 %v727_v58  ;;  %v212_v13 = vld [vmem:[%s1248_s7 + $0x88] sm:$0xff]  ;;  %v54_v20 = vunpack.c.h.bf16 %v1014_v12  ;;  %v211_v23 = vld [vmem:[%s1248_s7 + $0x80] sm:$0xff]  ;;  %v213_v24 = vld [vmem:[%s1248_s7 + $0x90] sm:$0xff]  ;;  %v53_v34 = vunpack.c.l.bf16 %v1014_v12  ;;  %v44_v37 = vunpack.c.h.bf16 %v1029_v21  ;;  %v43_v45 = vunpack.c.l.bf16 %v1029_v21  ;;  %303 = vmatprep.mubr.f32.mxu1 %v790_v4 }
  0x14   :  { %v735_v22 = vpack.c.bf16 %v214_v14, %v212_v13  ;;  %v1040_v28 = vld [vmem:[%s1247_s1 + $0x10] sm:$0xff]  ;;  %v216_v29 = vld [vmem:[%s1248_s7 + $0xa8] sm:$0xff]  ;;  %v218_v30 = vld [vmem:[%s1248_s7 + $0xb8] sm:$0xff]  ;;  %v737_v35 = vpack.c.bf16 %v213_v24, %v211_v23 }
  0x15   :  { %706 = vmatpush3.bf16.msra.mxu0 %v705_v42  ;;  %v62_v36 = vadd.f32 %v54_v20, %v42_v19  ;;  %v56_v38 = vunpack.c.h.bf16 %v1040_v28  ;;  %v739_v39 = vpack.c.bf16 %v218_v30, %v216_v29  ;;  %v215_v40 = vld [vmem:[%s1248_s7 + $0xa0] sm:$0xff]  ;;  %v217_v41 = vld [vmem:[%s1248_s7 + $0xb0] sm:$0xff]  ;;  %v1069_v42 = vld [vmem:[%s1246_s0 + $0x18] sm:$0xff]  ;;  %v61_v44 = vadd.f32 %v53_v34, %v41_v33 }
  0x16   :  { %708 = vmatprep.subr.bf16.mxu0 %v707_v47  ;;  %730 = vmatpush1.bf16.msra.mxu1 %v729_v5  ;;  %v1074_v43 = vld [vmem:[%s1247_s1 + $0x18] sm:$0xff]  ;;  %v55_v46 = vunpack.c.l.bf16 %v1040_v28  ;;  %v741_v47 = vpack.c.bf16 %v217_v41, %v215_v40  ;;  %v46_v49 = vunpack.c.h.bf16 %v1069_v42  ;;  %v45_v52 = vunpack.c.l.bf16 %v1069_v42  ;;  %v219_v59 = vld [vmem:[%s1248_s7 + $0xc0] sm:$0xff]  ;;  %v221_v60 = vld [vmem:[%s1248_s7 + $0xd0] sm:$0xff] }
  0x17   :  { %732 = vmatprep.subr.bf16.mxu1 %v731_v8  ;;  %v64_v48 = vadd.f32 %v56_v38, %v44_v37  ;;  %v58_v50 = vunpack.c.h.bf16 %v1074_v43  ;;  %v57_v53 = vunpack.c.l.bf16 %v1074_v43  ;;  %v222_v57 = vld [vmem:[%s1248_s7 + $0xd8] sm:$0xff]  ;;  %v224_v62 = vld [vmem:[%s1248_s7 + $0xe8] sm:$0xff]  ;;  %v223_v1 = vld [vmem:[%s1248_s7 + $0xe0] sm:$0xff] }
  0x18   :  { %v63_v51 = vadd.f32 %v55_v46, %v43_v45  ;;  %v226_v63 = vld [vmem:[%s1248_s7 + $0xf8] sm:$0xff]  ;;  %v225_v2 = vld [vmem:[%s1248_s7 + $0xf0] sm:$0xff]  ;;  %v413_v5 = vld [vmem:[%s1249_s9 + $0x8] sm:$0xff] }
  0x19   :  { %710 = vmatpush3.bf16.msra.mxu0 %v709_v56  ;;  %v66_v54 = vadd.f32 %v58_v50, %v46_v49  ;;  %v65_v55 = vadd.f32 %v57_v53, %v45_v52  ;;  %v220_v56 = vld [vmem:[%s1248_s7 + $0xc8] sm:$0xff]  ;;  %v747_v0 = vpack.c.bf16 %v226_v63, %v224_v62  ;;  %v749_v3 = vpack.c.bf16 %v225_v2, %v223_v1  ;;  %v412_v8 = vld [vmem:[%s1249_s9] sm:$0xff]  ;;  %v414_v10 = vld [vmem:[%s1249_s9 + $0x10] sm:$0xff] }
  0x1a   :  { %712 = vmatprep.subr.bf16.mxu0 %v711_v61  ;;  %734 = vmatpush1.bf16.msra.mxu1 %v733_v17  ;;  %v743_v58 = vpack.c.bf16 %v222_v57, %v220_v56  ;;  %v745_v61 = vpack.c.bf16 %v221_v60, %v219_v59  ;;  %v408_v13 = vld [vmem:[%s1250_s2] sm:$0xff]  ;;  %v409_v14 = vld [vmem:[%s1250_s2 + $0x8] sm:$0xff]  ;;  %v411_v59 = vld [vmem:[%s1250_s2 + $0x18] sm:$0xff] }
  0x1b   :  { %736 = vmatprep.subr.bf16.mxu1 %v735_v22 }
  0x1d   :  { %714 = vmatpush3.bf16.msra.mxu0 %v713_v6  ;;  %v415_v6 = vld [vmem:[%s1249_s9 + $0x18] sm:$0xff] }
  0x1e   :  { %716 = vmatprep.subr.bf16.mxu0 %v715_v11  ;;  %738 = vmatpush1.bf16.msra.mxu1 %v737_v35  ;;  %v751_v9 = vpack.c.bf16 %v415_v6, %v413_v5  ;;  %v753_v11 = vpack.c.bf16 %v414_v10, %v412_v8  ;;  %v328_v5 = vld [vmem:[%s1253_s4] sm:$0x3] }
  0x1f   :  { %740 = vmatprep.subr.bf16.mxu1 %v739_v39 }
  0x21   :  { %718 = vmatpush3.bf16.msra.mxu0 %v717_v18  ;;  %v622_v18 = vld [vmem:[%s1251_s6] ss:$0 sm:$0xff] }
  0x22   :  { %742 = vmatpush1.bf16.msra.mxu1 %v741_v47  ;;  %752 = vmatprep.subr.bf16.mxu0 %v751_v9 }
  0x23   :  { %744 = vmatprep.subr.bf16.mxu1 %v743_v58  ;;  %v410_v58 = vld [vmem:[%s1250_s2 + $0x10] sm:$0xff] }
  0x24   :  { %171 = vmatmul.mubr.f32.vlgmr.msra.gmra.mrb[0].mxu0 %v59_v31 }
  0x25   :  { %175 = vmatprep.mubr.f32.mxu0 %v62_v36  ;;  %754 = vmatpush1.bf16.msra.mxu0 %v753_v11 }
  0x26   :  { %746 = vmatpush1.bf16.msra.mxu1 %v745_v61 }
  0x27   :  { %748 = vmatprep.subr.bf16.mxu1 %v747_v0  ;;  %v229_v0 = vlaneseq }
  0x28   :  { %176 = vmatmul.mubr.f32.gmra.mrb[2].mxu0 %v61_v44 }
  0x29   :  { %180 = vmatprep.mubr.f32.mxu0 %v64_v48  ;;  %v230_v1 = vshrl.u32 %v229_v0, 7 }
  0x2a   :  { %750 = vmatpush1.bf16.msra.mxu1 %v749_v3  ;;  %v227_v3 = vld [vmem:[%s1252_s8] sm:$0x3] }
  0x2b   :  { %755 = vmatprep.subr.bf16.mxu1 %v751_v9  ;;  %v1165_v2 = vsub.s32 0, %v230_v1 }
  0x2c   :  { %181 = vmatmul.mubr.f32.gmra.mrb[4].mxu0 %v63_v51 }
  0x2d   :  { %185 = vmatprep.mubr.f32.mxu0 %v66_v54  ;;  %v232_v6 = vrot.slane %v227_v3, %v1165_v2  ;;  %v335_v9 = vrot.slane %v328_v5, %v1165_v2 }
  0x30   :  { %186 = vmatmul.mubr.f32.gmra.mrb[6].mxu0 %v65_v55 }
  0x31   :  { %493 = vmatprep.mubr.f32.mxu0 %v790_v4 }
  0x34   :  { %631 = vmatmul.mubr.msk.f32.vlgmr.msra.gmra.mrb[8].mxu0 %vm416_vm0, %v408_v13 }
  0x35   :  { %499 = vmatprep.mubr.f32.mxu0 %v790_v4 }
  0x38   :  { %632 = vmatmul.mubr.msk.f32.gmra.mrb[10].mxu0 %vm416_vm0, %v409_v14 }
  0xf7   :  { %v675_v17 = vpop.f32.mrb[0].mxu0 }
  0xf8   :  { %v676_v22 = vpop.f32.mrb[1].mxu0 }
  0xf9   :  { %v677_v23 = vadd.f32 %v676_v22, %v675_v17 }
  0xfb   :  { %v173_v24 = vadd.f32 %v677_v23, %v622_v18  ;;  %v678_v29 = vpop.f32.mrb[2].mxu0 }
  0xfc   :  { %v679_v30 = vpop.f32.mrb[3].mxu0 }
  0xfd   :  { %v191_v31 = vmax.f32 %v173_v24, 0.0  ;;  %v680_v35 = vadd.f32 %v679_v30, %v678_v29  ;;  %v329_v24 = vld [vmem:[%s1253_s4 + $0x2] sm:$0x3] }
  0xff   :  { %v178_v36 = vadd.f32 %v680_v35, %v622_v18  ;;  %v681_v39 = vpop.f32.mrb[4].mxu0  ;;  %304 = vmatmul.mubr.f32.vlgmr.msra.gmra.mrb[0].mxu1 %v191_v31 }
 0x100   :  { %v682_v40 = vpop.f32.mrb[5].mxu0  ;;  %309 = vmatprep.mubr.f32.mxu1 %v790_v4  ;;  %756 = vmatpush1.bf16.msra.mxu1 %v753_v11 }
 0x101   :  { %v192_v41 = vmax.f32 %v178_v36, 0.0  ;;  %v683_v44 = vadd.f32 %v682_v40, %v681_v39  ;;  %v343_v40 = vrot.slane %v329_v24, %v1165_v2 }
 0x103   :  { %v183_v47 = vadd.f32 %v683_v44, %v622_v18  ;;  %v684_v48 = vpop.f32.mrb[6].mxu0  ;;  %310 = vmatmul.mubr.f32.gmra.mrb[2].mxu1 %v192_v41 }
 0x104   :  { %v685_v51 = vpop.f32.mrb[7].mxu0  ;;  %315 = vmatprep.mubr.f32.mxu1 %v790_v4 }
 0x105   :  { %v193_v54 = vmax.f32 %v183_v47, 0.0  ;;  %v686_v55 = vadd.f32 %v685_v51, %v684_v48 }
 0x107   :  { %v188_v56 = vadd.f32 %v686_v55, %v622_v18  ;;  %316 = vmatmul.mubr.f32.gmra.mrb[4].mxu1 %v193_v54  ;;  %v1157_v60 = vpop.f32.mrb[8].mxu0 }
 0x108   :  { %321 = vmatprep.mubr.f32.mxu1 %v790_v4  ;;  %v1159_v61 = vpop.f32.mrb[9].mxu0 }
 0x109   :  { %v194_v57 = vmax.f32 %v188_v56, 0.0 }
 0x10b   :  { %322 = vmatmul.mubr.f32.gmra.mrb[6].mxu1 %v194_v57  ;;  %v1161_v62 = vpop.f32.mrb[10].mxu0 }
 0x10c   :  { %505 = vmatprep.mubr.f32.mxu1 %v790_v4  ;;  %v1163_v63 = vpop.f32.mrb[11].mxu0 }
 0x10f   :  { %633 = vmatmul.mubr.msk.f32.vlgmr.msra.gmra.mrb[8].mxu1 %vm416_vm0, %v410_v58 }
 0x110   :  { %511 = vmatprep.mubr.f32.mxu1 %v790_v4  ;;  %v1170_v4 = vsub.s32 1, %v230_v1 }
 0x112   :  { %v236_v8 = vrot.slane %v227_v3, %v1170_v4  ;;  %v339_v11 = vrot.slane %v328_v5, %v1170_v4  ;;  %v347_v47 = vrot.slane %v329_v24, %v1170_v4 }
 0x113   :  { %634 = vmatmul.mubr.msk.f32.gmra.mrb[10].mxu1 %vm416_vm0, %v411_v59 }
 0x1d2   :  { %v305_v10 = vpop.f32.mrb[0].mxu1 }
 0x1d3   :  { %v306_v13 = vadd.f32 %v305_v10, %v232_v6  ;;  %v307_v14 = vpop.f32.mrb[1].mxu1 }
 0x1d4   :  { %v308_v17 = vadd.f32 %v307_v14, %v236_v8 }
 0x1d5   :  { %v352_v18 = vadd.f32 %v335_v9, %v306_v13 }
 0x1d6   :  { %v353_v22 = vadd.f32 %v339_v11, %v308_v17  ;;  %v311_v23 = vpop.f32.mrb[2].mxu1 }
 0x1d7   :  { %v623_v29 = vmul.f32 -1.442695, %v352_v18  ;;  %v312_v30 = vadd.f32 %v311_v23, %v232_v6  ;;  %v313_v31 = vpop.f32.mrb[3].mxu1 }
 0x1d8   :  { %v624_v35 = vmul.f32 -1.442695, %v353_v22  ;;  %v314_v36 = vadd.f32 %v313_v31, %v236_v8 }
 0x1d9   :  { %758 = vpow2.f32 %v623_v29  ;;  %v354_v39 = vadd.f32 %v335_v9, %v312_v30 }
 0x1da   :  { %760 = vpow2.f32 %v624_v35  ;;  %v355_v41 = vadd.f32 %v339_v11, %v314_v36  ;;  %v317_v44 = vpop.f32.mrb[4].mxu1 }
 0x1db   :  { %v625_v48 = vmul.f32 -1.442695, %v354_v39  ;;  %v318_v51 = vadd.f32 %v317_v44, %v232_v6  ;;  %v319_v54 = vpop.f32.mrb[5].mxu1 }
 0x1dc   :  { %v626_v55 = vmul.f32 -1.442695, %v355_v41  ;;  %v320_v56 = vadd.f32 %v319_v54, %v236_v8 }
 0x1dd   :  { %762 = vpow2.f32 %v625_v48  ;;  %v356_v57 = vadd.f32 %v343_v40, %v318_v51 }
 0x1de   :  { %764 = vpow2.f32 %v626_v55  ;;  %v357_v58 = vadd.f32 %v347_v47, %v320_v56  ;;  %v323_v59 = vpop.f32.mrb[6].mxu1  ;;  %v519_v55 = vld [vmem:[%s1254_s3 + $0x2] sm:$0x3] }
 0x1df   :  { %v627_v0 = vmul.f32 -1.442695, %v356_v57  ;;  %v324_v1 = vadd.f32 %v323_v59, %v232_v6  ;;  %v325_v3 = vpop.f32.mrb[7].mxu1  ;;  %v518_v6 = vld [vmem:[%s1254_s3] sm:$0x3] }
 0x1e0   :  { %v628_v5 = vmul.f32 -1.442695, %v357_v58  ;;  %v326_v9 = vadd.f32 %v325_v3, %v236_v8  ;;  %v529_v41 = vrot.slane %v518_v6, %v1170_v4 }
 0x1e1   :  { %766 = vpow2.f32 %v627_v0  ;;  %v358_v10 = vadd.f32 %v343_v40, %v324_v1  ;;  %v525_v40 = vrot.slane %v518_v6, %v1165_v2  ;;  %v533_v0 = vrot.slane %v519_v55, %v1165_v2 }
 0x1e2   :  { %768 = vpow2.f32 %v628_v5  ;;  %v359_v11 = vadd.f32 %v347_v47, %v326_v9  ;;  %v507_v13 = vpop.f32.mrb[8].mxu1  ;;  %v543_v56 = vmul.f32 %v529_v41, %v1159_v61 }
 0x1e3   :  { %v759_v14 = vpop.eup %758  ;;  %v629_v17 = vmul.f32 -1.442695, %v358_v10  ;;  %v509_v18 = vpop.f32.mrb[9].mxu1  ;;  %v542_v54 = vmul.f32 %v525_v40, %v1157_v60  ;;  %v544_v5 = vmul.f32 %v525_v40, %v1161_v62  ;;  %v545_v10 = vmul.f32 %v529_v41, %v1163_v63 }
 0x1e4   :  { %v761_v22 = vpop.eup %760  ;;  %v384_v23 = vadd.f32 1.0, %v759_v14  ;;  %v630_v24 = vmul.f32 -1.442695, %v359_v11  ;;  %v537_v11 = vrot.slane %v519_v55, %v1170_v4 }
 0x1e5   :  { %v385_v29 = vadd.f32 1.0, %v761_v22  ;;  %770 = vpow2.f32 %v629_v17 }
 0x1e6   :  { %772 = vrcp.f32 %v384_v23  ;;  %v513_v30 = vpop.f32.mrb[10].mxu1  ;;  %v546_v23 = vmul.f32 %v533_v0, %v507_v13 }
 0x1e7   :  { %v763_v8 = vpop.eup %762  ;;  %774 = vrcp.f32 %v385_v29  ;;  %v1187_v31 = vpop.f32.mrb[11].mxu1  ;;  %v548_v25 = vmul.f32 %v533_v0, %v513_v30 }
 0x1e8   :  { %v765_v35 = vpop.eup %764  ;;  %v386_v36 = vadd.f32 1.0, %v763_v8  ;;  %776 = vpow2.f32 %v630_v24  ;;  %v547_v8 = vmul.f32 %v537_v11, %v509_v18 }
 0x1e9   :  { %v387_v39 = vadd.f32 1.0, %v765_v35 }
 0x1ea   :  { %778 = vrcp.f32 %v386_v36 }
 0x1eb   :  { %v767_v44 = vpop.eup %766  ;;  %780 = vrcp.f32 %v387_v39 }
 0x1ec   :  { %v769_v47 = vpop.eup %768  ;;  %v388_v48 = vadd.f32 1.0, %v767_v44 }
 0x1ed   :  { %v389_v51 = vadd.f32 1.0, %v769_v47 }
 0x1ee   :  { %782 = vrcp.f32 %v388_v48 }
 0x1ef   :  { %v771_v57 = vpop.eup %770  ;;  %784 = vrcp.f32 %v389_v51 }
 0x1f0   :  { %v773_v58 = vpop.eup %772  ;;  %v390_v59 = vadd.f32 1.0, %v771_v57 }
 0x1f1   :  { %v775_v1 = vpop.eup %774  ;;  %v550_v3 = vadd.f32 %v773_v58, %v542_v54 }
 0x1f2   :  { %v777_v9 = vpop.eup %776  ;;  %786 = vrcp.f32 %v390_v59  ;;  %v551_v60 = vadd.f32 %v775_v1, %v543_v56 }
 0x1f3   :  { %v391_v14 = vadd.f32 1.0, %v777_v9  ;;  %v566_v17 = vsub.f32 1.0, %v550_v3  ;;  %v558_v2 = vmul.f32 %v550_v3, %v39_v15 }
 0x1f4   :  { %v779_v61 = vpop.eup %778  ;;  %v567_v22 = vsub.f32 1.0, %v551_v60  ;;  %v559_v6 = vmul.f32 %v551_v60, %v40_v26 }
 0x1f5   :  { %v781_v24 = vpop.eup %780  ;;  %788 = vrcp.f32 %v391_v14  ;;  %v574_v62 = vmul.f32 %v566_v17, %v51_v16  ;;  %v552_v29 = vadd.f32 %v779_v61, %v544_v5 }
 0x1f6   :  { %v575_v63 = vmul.f32 %v567_v22, %v52_v32  ;;  %v553_v4 = vadd.f32 %v781_v24, %v545_v10 }
 0x1f7   :  { %v582_v35 = vadd.f32 %v574_v62, %v558_v2  ;;  %v568_v36 = vsub.f32 1.0, %v552_v29  ;;  %v560_v15 = vmul.f32 %v552_v29, %v41_v33 }
 0x1f8   :  { %v783_v13 = vpop.eup %782  ;;  %v583_v39 = vadd.f32 %v575_v63, %v559_v6  ;;  %v569_v40 = vsub.f32 1.0, %v553_v4  ;;  %v561_v27 = vmul.f32 %v553_v4, %v42_v19 }
 0x1f9   :  { %v785_v41 = vpop.eup %784  ;;  %v576_v16 = vmul.f32 %v568_v36, %v53_v34  ;;  %v554_v44 = vadd.f32 %v783_v13, %v546_v23  ;;  %v549_v34 = vmul.f32 %v537_v11, %v1187_v31 }
 0x1fa   :  { %v639_v26 = vpack.c.bf16 %v583_v39, %v582_v35  ;;  %v577_v32 = vmul.f32 %v569_v40, %v54_v20  ;;  %v555_v18 = vadd.f32 %v785_v41, %v547_v8 }
 0x1fb   :  { %v584_v47 = vadd.f32 %v576_v16, %v560_v15  ;;  %v570_v48 = vsub.f32 1.0, %v554_v44  ;;  %v562_v30 = vmul.f32 %v554_v44, %v43_v45 }
 0x1fc   :  { %v787_v51 = vpop.eup %786  ;;  %614 = vst [vmem:[%s1255_s10] sm:$0xff] %v639_v26  ;;  %v585_v33 = vadd.f32 %v577_v32, %v561_v27  ;;  %v571_v54 = vsub.f32 1.0, %v555_v18  ;;  %v563_v20 = vmul.f32 %v555_v18, %v44_v37 }
 0x1fd   :  { %v578_v7 = vmul.f32 %v570_v48, %v55_v46  ;;  %v556_v12 = vadd.f32 %v787_v51, %v548_v25 }
 0x1fe   :  { %v640_v19 = vpack.c.bf16 %v585_v33, %v584_v47  ;;  %v579_v55 = vmul.f32 %v571_v54, %v56_v38 }
 0x1ff   :  { %v789_v56 = vpop.eup %788  ;;  %v586_v57 = vadd.f32 %v578_v7, %v562_v30  ;;  %v572_v58 = vsub.f32 1.0, %v556_v12  ;;  %v564_v21 = vmul.f32 %v556_v12, %v45_v52 }
 0x200   :  { %615 = vst [vmem:[%s1255_s10 + $0x8] sm:$0xff] %v640_v19  ;;  %v587_v31 = vadd.f32 %v579_v55, %v563_v20  ;;  %v557_v45 = vadd.f32 %v789_v56, %v549_v34 }
 0x201   :  { %v580_v46 = vmul.f32 %v572_v58, %v57_v53 }
 0x202   :  { %v641_v59 = vpack.c.bf16 %v587_v31, %v586_v57  ;;  %v573_v37 = vsub.f32 1.0, %v557_v45  ;;  %v565_v38 = vmul.f32 %v557_v45, %v46_v49 }
 0x203   :  { %v588_v28 = vadd.f32 %v580_v46, %v564_v21 }
 0x204   :  { %616 = vst [vmem:[%s1255_s10 + $0x10] sm:$0xff] %v641_v59  ;;  %v581_v0 = vmul.f32 %v573_v37, %v58_v50 }
 0x206   :  { %v589_v1 = vadd.f32 %v581_v0, %v565_v38 }
 0x208   :  { %v642_v3 = vpack.c.bf16 %v589_v1, %v588_v28 }
 0x20a   :  { %617 = vst [vmem:[%s1255_s10 + $0x18] sm:$0xff] %v642_v3 }

</bundles_post_ra>
